<compile_context>
chip_gen: v5e
topology: v5e:2x2
jax: 0.10.0
libtpu: 0.0.40
codegen_flags: <defaults>
</compile_context>

<pallas_src>
from typing import NamedTuple

import jax
import jax.numpy as jnp
import numpy as np
from jax.experimental import pallas as pl
from jax.experimental.pallas import tpu as pltpu


def _round_up(n, m):
    return ((n + m - 1) // m) * m


class DecoderParams(NamedTuple):
    w1: jax.Array        # (z_dim, Hp), Hp = round_up(hidden, 128)
    b1: jax.Array        # (1, Hp), f32
    w2: jax.Array        # (Hp, Op),  Op = round_up(output, 128)
    b2: jax.Array        # (1, Op), f32
    out_features: int    # unpadded output size


def prepare_decoder_params(w1, b1, w2, b2, *, use_bf16=False):
    """One-time (init-time) weight prep, hoisted out of the per-call hot path.

    w1: (z_dim, hidden)   -- transposed vs. torch Linear.weight
    b1: (hidden,) or (1, hidden)
    w2: (hidden, output)
    b2: (output,) or (1, output)

    Only the lane dims that feed the MXU N-side / the output store are padded
    (H, O); the contraction dim Z stays unpadded.  Zero padding is an exact
    no-op for the matmuls; padded output columns are sliced off in the wrapper.
    """
    b1 = jnp.asarray(b1, jnp.float32).reshape(1, -1)
    b2 = jnp.asarray(b2, jnp.float32).reshape(1, -1)
    Z, H = w1.shape
    H2, O = w2.shape
    assert H2 == H and b1.shape[1] == H and b2.shape[1] == O, "bad param shapes"

    Hp, Op = _round_up(H, 128), _round_up(O, 128)
    if Hp != H:
        w1 = jnp.pad(w1, ((0, 0), (0, Hp - H)))
        b1 = jnp.pad(b1, ((0, 0), (0, Hp - H)))
        w2 = jnp.pad(w2, ((0, Hp - H), (0, 0)))
    if Op != O:
        w2 = jnp.pad(w2, ((0, 0), (0, Op - O)))
        b2 = jnp.pad(b2, ((0, 0), (0, Op - O)))

    if use_bf16:
        # bf16 matmul operands: full-rate 256x256 MXU on v6e/v7x, half the
        # weight DMA.  Biases + the epilogue stay f32 inside the kernel.
        w1 = w1.astype(jnp.bfloat16)
        w2 = w2.astype(jnp.bfloat16)
    else:
        w1 = w1.astype(jnp.float32)
        w2 = w2.astype(jnp.float32)
    return DecoderParams(w1, b1, w2, b2, O)


def decoder_kernel(x_ref, w1_ref, b1_ref, w2_ref, b2_ref, o_ref):
    # Two MXU matmuls (f32 accumulation) + VPU ReLU + EUP sigmoid, all in VMEM.
    # Matmul operands follow the weight dtype (f32 or bf16); the bias-add /
    # ReLU / sigmoid epilogue stays in f32 (v5e's VPU/EUP have no bf16 path).
    x = x_ref[...].astype(w1_ref.dtype)
    h = jnp.dot(x, w1_ref[...], preferred_element_type=jnp.float32) + b1_ref[...]
    h = jnp.maximum(h, 0.0)                                    # ReLU (f32)
    y = jnp.dot(h.astype(w2_ref.dtype), w2_ref[...],
                preferred_element_type=jnp.float32) + b2_ref[...]
    o_ref[...] = jax.nn.sigmoid(y).astype(o_ref.dtype)         # Sigmoid


def _pick_batch_tile(B, block_batch):
    if block_batch is None:
        if B < 512:
            block_batch = B                      # single block: zero per-step overhead
        else:
            # >= 2 grid steps so the "parallel" axis shards across v7x's two
            # TensorCores; 512-1024-row tiles sit near the HBM roofline.
            n_tiles = max(2, pl.cdiv(B, 1024))
            block_batch = pl.cdiv(B, n_tiles)
    # Multiple-of-8 sublane dim => unmasked x loads / output stores.
    return _round_up(max(1, min(block_batch, B)), 8)


def decoder_forward(x, params: DecoderParams, *, block_batch=None):
    """x: (B, z_dim), f32 or bf16; params from prepare_decoder_params()."""
    w1, b1, w2, b2, O = params
    B, Z = x.shape
    assert w1.shape[0] == Z, "x feature dim must match w1"
    Hp, Op = w1.shape[1], w2.shape[1]
    out_dtype = x.dtype

    tb = _pick_batch_tile(B, block_batch)
    Bp = _round_up(B, tb)
    if Bp != B:
        x = jnp.pad(x, ((0, Bp - B), (0, 0)))     # batch rows only; Z untouched
    grid = (Bp // tb,)

    x_bytes = x.dtype.itemsize
    w_bytes = w1.dtype.itemsize
    o_bytes = np.dtype(out_dtype).itemsize
    cost = pl.CostEstimate(
        flops=2 * Bp * (Z * Hp + Hp * Op),
        transcendentals=Bp * Op,
        bytes_accessed=(Bp * Z * x_bytes + (Z * Hp + Hp * Op) * w_bytes
                        + (Hp + Op) * 4 + Bp * Op * o_bytes),
    )
    # Scoped-VMEM budget: double-buffered x/out tiles + weights, with slack.
    # (v5e defaults to only 16 MiB scoped; v7x has 64 MiB physical.)
    vmem_needed = (2 * tb * Z * x_bytes + 2 * tb * Op * o_bytes
                   + 2 * (Z * Hp + Hp * Op) * w_bytes + 2 * (Hp + Op) * 4)
    vmem_limit = int(min(64 * 1024 * 1024,
                         max(32 * 1024 * 1024, 2 * vmem_needed)))

    def run(single_buffer_weights):
        if single_buffer_weights:
            # Grid-invariant operands: one VMEM buffer instead of two.
            def wspec(shape):
                return pl.BlockSpec(shape, lambda i: (0, 0),
                                    pipeline_mode=pl.Buffered(1))
        else:
            def wspec(shape):
                return pl.BlockSpec(shape, lambda i: (0, 0))
        return pl.pallas_call(
            decoder_kernel,
            out_shape=jax.ShapeDtypeStruct((Bp, Op), out_dtype),
            grid_spec=pl.GridSpec(
                grid=grid,
                in_specs=[
                    pl.BlockSpec((tb, Z), lambda i: (i, 0)),   # x tile, Z unpadded
                    wspec((Z, Hp)),                            # w1 (VMEM-resident)
                    wspec((1, Hp)),                            # b1
                    wspec((Hp, Op)),                           # w2 (VMEM-resident)
                    wspec((1, Op)),                            # b2
                ],
                out_specs=pl.BlockSpec((tb, Op), lambda i: (i, 0)),
            ),
            compiler_params=pltpu.CompilerParams(
                dimension_semantics=("parallel",),
                vmem_limit_bytes=vmem_limit),
            cost_estimate=cost,
        )(x, w1, b1, w2, b2)

    try:
        out = run(True)
    except Exception:
        # Fallback if single-buffer pipeline_mode is unsupported on this jax.
        out = run(False)

    if Bp != B or Op != O:
        out = out[:B, :O]   # strip batch / output-lane padding only when present
    return out


if __name__ == "__main__":
    # Small shapes consistent with the module's forward.
    batch, z_dim, hidden_size, output_size = 16, 32, 64, 128

    key = jax.random.PRNGKey(0)
    kx, k1, k2, k3, k4 = jax.random.split(key, 5)

    # Deterministic parameter init (mimics torch.nn.Linear uniform bounds).
    lim1 = 1.0 / np.sqrt(z_dim)
    lim2 = 1.0 / np.sqrt(hidden_size)
    x = jax.random.normal(kx, (batch, z_dim), dtype=jnp.float32)
    w1 = jax.random.uniform(k1, (z_dim, hidden_size), jnp.float32, -lim1, lim1)
    b1 = jax.random.uniform(k2, (hidden_size,), jnp.float32, -lim1, lim1)
    w2 = jax.random.uniform(k3, (hidden_size, output_size), jnp.float32, -lim2, lim2)
    b2 = jax.random.uniform(k4, (output_size,), jnp.float32, -lim2, lim2)

    # Pure-JAX reference (same semantics as the torch module forward).
    ref = jax.nn.sigmoid(jnp.maximum(x @ w1 + b1, 0.0) @ w2 + b2)

    # f32 path (tight tolerance).
    params_f32 = prepare_decoder_params(w1, b1, w2, b2)
    out = jax.block_until_ready(decoder_forward(x, params_f32))
    np.testing.assert_allclose(np.asarray(out), np.asarray(ref),
                               rtol=1e-5, atol=1e-5)

    # bf16 matmul-operand fast path (f32 epilogue; looser tolerance).
    params_bf16 = prepare_decoder_params(w1, b1, w2, b2, use_bf16=True)
    out_bf16 = jax.block_until_ready(decoder_forward(x, params_bf16))
    np.testing.assert_allclose(np.asarray(out_bf16), np.asarray(ref),
                               rtol=2e-2, atol=2e-2)

    # Exercise the multi-tile (grid >= 2, batch-padded) path as well.
    xb = jax.random.normal(kx, (600, z_dim), dtype=jnp.float32)
    refb = jax.nn.sigmoid(jnp.maximum(xb @ w1 + b1, 0.0) @ w2 + b2)
    outb = jax.block_until_ready(decoder_forward(xb, params_f32))
    np.testing.assert_allclose(np.asarray(outb), np.asarray(refb),
                               rtol=1e-5, atol=1e-5)

    print("KERNEL_OK")
</pallas_src>

<mosaic_0001>
module attributes {stable_mosaic.version = 11 : i64} {
  func.func @decoder_kernel(%arg0: i32, %arg1: memref<16x32xf32, #tpu.memory_space<vmem>>, %arg2: memref<32x128xf32, #tpu.memory_space<vmem>>, %arg3: memref<1x128xf32, #tpu.memory_space<vmem>>, %arg4: memref<128x128xf32, #tpu.memory_space<vmem>>, %arg5: memref<1x128xf32, #tpu.memory_space<vmem>>, %arg6: memref<16x128xf32, #tpu.memory_space<vmem>>) attributes {dimension_semantics = [#tpu.dimension_semantics<parallel>], iteration_bounds = array<i64: 1>, scalar_prefetch = 0 : i64, scratch_operands = 0 : i64, tpu.core_type = #tpu.core_type<tc>, window_params = [{transform_indices = @transform_0, window_bounds = array<i64: 16, 32>}, {pipeline_mode = #tpu.pipeline_mode<synchronous>, transform_indices = @transform_1, window_bounds = array<i64: 32, 128>}, {pipeline_mode = #tpu.pipeline_mode<synchronous>, transform_indices = @transform_2, window_bounds = array<i64: 1, 128>}, {pipeline_mode = #tpu.pipeline_mode<synchronous>, transform_indices = @transform_3, window_bounds = array<i64: 128, 128>}, {pipeline_mode = #tpu.pipeline_mode<synchronous>, transform_indices = @transform_4, window_bounds = array<i64: 1, 128>}, {transform_indices = @transform_5, window_bounds = array<i64: 16, 128>}]} {
    %c0 = arith.constant 0 : index
    %c0_0 = arith.constant 0 : index
    %0 = vector.load %arg1[%c0, %c0_0] : memref<16x32xf32, #tpu.memory_space<vmem>>, vector<16x32xf32>
    %c0_1 = arith.constant 0 : index
    %c0_2 = arith.constant 0 : index
    %1 = vector.load %arg2[%c0_1, %c0_2] : memref<32x128xf32, #tpu.memory_space<vmem>>, vector<32x128xf32>
    %cst = arith.constant dense<0.000000e+00> : vector<16x128xf32>
    %2 = tpu.matmul %0, %1, %cst {dimension_numbers = #tpu.dot_dimension_numbers<[1], [0], [0], [1], [0, 0, 1, 1], [], []>} : vector<16x32xf32>, vector<32x128xf32>, vector<16x128xf32> -> vector<16x128xf32>
    %c0_3 = arith.constant 0 : index
    %c0_4 = arith.constant 0 : index
    %3 = vector.load %arg3[%c0_3, %c0_4] : memref<1x128xf32, #tpu.memory_space<vmem>>, vector<1x128xf32>
    %4 = vector.broadcast %3 : vector<1x128xf32> to vector<16x128xf32>
    %5 = arith.addf %2, %4 : vector<16x128xf32>
    %cst_5 = arith.constant 0.000000e+00 : f32
    %6 = vector.broadcast %cst_5 : f32 to vector<16x128xf32>
    %7 = arith.maximumf %5, %6 : vector<16x128xf32>
    %c0_6 = arith.constant 0 : index
    %c0_7 = arith.constant 0 : index
    %8 = vector.load %arg4[%c0_6, %c0_7] : memref<128x128xf32, #tpu.memory_space<vmem>>, vector<128x128xf32>
    %cst_8 = arith.constant dense<0.000000e+00> : vector<16x128xf32>
    %9 = tpu.matmul %7, %8, %cst_8 {dimension_numbers = #tpu.dot_dimension_numbers<[1], [0], [0], [1], [0, 0, 1, 1], [], []>} : vector<16x128xf32>, vector<128x128xf32>, vector<16x128xf32> -> vector<16x128xf32>
    %c0_9 = arith.constant 0 : index
    %c0_10 = arith.constant 0 : index
    %10 = vector.load %arg5[%c0_9, %c0_10] : memref<1x128xf32, #tpu.memory_space<vmem>>, vector<1x128xf32>
    %11 = vector.broadcast %10 : vector<1x128xf32> to vector<16x128xf32>
    %12 = arith.addf %9, %11 : vector<16x128xf32>
    %13 = arith.negf %12 : vector<16x128xf32>
    %14 = math.exp %13 : vector<16x128xf32>
    %cst_11 = arith.constant 1.000000e+00 : f32
    %15 = vector.broadcast %cst_11 : f32 to vector<16x128xf32>
    %16 = arith.addf %15, %14 : vector<16x128xf32>
    %17 = arith.divf %15, %16 : vector<16x128xf32>
    %c0_12 = arith.constant 0 : index
    %c0_13 = arith.constant 0 : index
    %18 = vector.load %arg6[%c0_12, %c0_13] : memref<16x128xf32, #tpu.memory_space<vmem>>, vector<16x128xf32>
    tpu.vector_store %arg6[%c0_12, %c0_13], %17 {strides = array<i32>} : memref<16x128xf32, #tpu.memory_space<vmem>>, vector<16x128xf32>,
    return
  }
  func.func @transform_0(%arg0: i32) -> (i32, i32) {
    %c0_i32 = arith.constant 0 : i32
    %c0_i32_0 = arith.constant 0 : i32
    return %arg0, %c0_i32 : i32, i32
  }
  func.func @transform_1(%arg0: i32) -> (i32, i32) {
    %c0_i32 = arith.constant 0 : i32
    %c0_i32_0 = arith.constant 0 : i32
    %c0_i32_1 = arith.constant 0 : i32
    return %c0_i32, %c0_i32_0 : i32, i32
  }
  func.func @transform_2(%arg0: i32) -> (i32, i32) {
    %c0_i32 = arith.constant 0 : i32
    %c0_i32_0 = arith.constant 0 : i32
    %c0_i32_1 = arith.constant 0 : i32
    return %c0_i32, %c0_i32_0 : i32, i32
  }
  func.func @transform_3(%arg0: i32) -> (i32, i32) {
    %c0_i32 = arith.constant 0 : i32
    %c0_i32_0 = arith.constant 0 : i32
    %c0_i32_1 = arith.constant 0 : i32
    return %c0_i32, %c0_i32_0 : i32, i32
  }
  func.func @transform_4(%arg0: i32) -> (i32, i32) {
    %c0_i32 = arith.constant 0 : i32
    %c0_i32_0 = arith.constant 0 : i32
    %c0_i32_1 = arith.constant 0 : i32
    return %c0_i32, %c0_i32_0 : i32, i32
  }
  func.func @transform_5(%arg0: i32) -> (i32, i32) {
    %c0_i32 = arith.constant 0 : i32
    %c0_i32_0 = arith.constant 0 : i32
    return %arg0, %c0_i32 : i32, i32
  }
}

module attributes {stable_mosaic.version = 11 : i64} {
  func.func @decoder_kernel(%arg0: i32, %arg1: memref<16x32xf32, #tpu.memory_space<vmem>>, %arg2: memref<32x128xf32, #tpu.memory_space<vmem>>, %arg3: memref<1x128xf32, #tpu.memory_space<vmem>>, %arg4: memref<128x128xf32, #tpu.memory_space<vmem>>, %arg5: memref<1x128xf32, #tpu.memory_space<vmem>>, %arg6: memref<16x128xf32, #tpu.memory_space<vmem>>) attributes {dimension_semantics = [#tpu.dimension_semantics<parallel>], iteration_bounds = array<i64: 1>, scalar_prefetch = 0 : i64, scratch_operands = 0 : i64, tpu.core_type = #tpu.core_type<tc>, window_params = [{transform_indices = @transform_0, window_bounds = array<i64: 16, 32>}, {pipeline_mode = #tpu.pipeline_mode<synchronous>, transform_indices = @transform_1, window_bounds = array<i64: 32, 128>}, {pipeline_mode = #tpu.pipeline_mode<synchronous>, transform_indices = @transform_2, window_bounds = array<i64: 1, 128>}, {pipeline_mode = #tpu.pipeline_mode<synchronous>, transform_indices = @transform_3, window_bounds = array<i64: 128, 128>}, {pipeline_mode = #tpu.pipeline_mode<synchronous>, transform_indices = @transform_4, window_bounds = array<i64: 1, 128>}, {transform_indices = @transform_5, window_bounds = array<i64: 16, 128>}]} {
    %c0 = arith.constant 0 : index
    %c0_0 = arith.constant 0 : index
    %0 = vector.load %arg1[%c0, %c0_0] : memref<16x32xf32, #tpu.memory_space<vmem>>, vector<16x32xf32>
    %c0_1 = arith.constant 0 : index
    %c0_2 = arith.constant 0 : index
    %1 = vector.load %arg2[%c0_1, %c0_2] : memref<32x128xf32, #tpu.memory_space<vmem>>, vector<32x128xf32>
    %cst = arith.constant dense<0.000000e+00> : vector<16x128xf32>
    %2 = tpu.matmul %0, %1, %cst {dimension_numbers = #tpu.dot_dimension_numbers<[1], [0], [0], [1], [0, 0, 1, 1], [], []>} : vector<16x32xf32>, vector<32x128xf32>, vector<16x128xf32> -> vector<16x128xf32>
    %c0_3 = arith.constant 0 : index
    %c0_4 = arith.constant 0 : index
    %3 = vector.load %arg3[%c0_3, %c0_4] : memref<1x128xf32, #tpu.memory_space<vmem>>, vector<1x128xf32>
    %4 = vector.broadcast %3 : vector<1x128xf32> to vector<16x128xf32>
    %5 = arith.addf %2, %4 : vector<16x128xf32>
    %cst_5 = arith.constant 0.000000e+00 : f32
    %6 = vector.broadcast %cst_5 : f32 to vector<16x128xf32>
    %7 = arith.maximumf %5, %6 : vector<16x128xf32>
    %c0_6 = arith.constant 0 : index
    %c0_7 = arith.constant 0 : index
    %8 = vector.load %arg4[%c0_6, %c0_7] : memref<128x128xf32, #tpu.memory_space<vmem>>, vector<128x128xf32>
    %cst_8 = arith.constant dense<0.000000e+00> : vector<16x128xf32>
    %9 = tpu.matmul %7, %8, %cst_8 {dimension_numbers = #tpu.dot_dimension_numbers<[1], [0], [0], [1], [0, 0, 1, 1], [], []>} : vector<16x128xf32>, vector<128x128xf32>, vector<16x128xf32> -> vector<16x128xf32>
    %c0_9 = arith.constant 0 : index
    %c0_10 = arith.constant 0 : index
    %10 = vector.load %arg5[%c0_9, %c0_10] : memref<1x128xf32, #tpu.memory_space<vmem>>, vector<1x128xf32>
    %11 = vector.broadcast %10 : vector<1x128xf32> to vector<16x128xf32>
    %12 = arith.addf %9, %11 : vector<16x128xf32>
    %13 = arith.negf %12 : vector<16x128xf32>
    %14 = math.exp %13 : vector<16x128xf32>
    %cst_11 = arith.constant 1.000000e+00 : f32
    %15 = vector.broadcast %cst_11 : f32 to vector<16x128xf32>
    %16 = arith.addf %15, %14 : vector<16x128xf32>
    %17 = arith.divf %15, %16 : vector<16x128xf32>
    %c0_12 = arith.constant 0 : index
    %c0_13 = arith.constant 0 : index
    %18 = vector.load %arg6[%c0_12, %c0_13] : memref<16x128xf32, #tpu.memory_space<vmem>>, vector<16x128xf32>
    tpu.vector_store %arg6[%c0_12, %c0_13], %17 {strides = array<i32>} : memref<16x128xf32, #tpu.memory_space<vmem>>, vector<16x128xf32>,
    return
  }
  func.func @transform_0(%arg0: i32) -> (i32, i32) {
    %c0_i32 = arith.constant 0 : i32
    %c0_i32_0 = arith.constant 0 : i32
    return %arg0, %c0_i32 : i32, i32
  }
  func.func @transform_1(%arg0: i32) -> (i32, i32) {
    %c0_i32 = arith.constant 0 : i32
    %c0_i32_0 = arith.constant 0 : i32
    %c0_i32_1 = arith.constant 0 : i32
    return %c0_i32, %c0_i32_0 : i32, i32
  }
  func.func @transform_2(%arg0: i32) -> (i32, i32) {
    %c0_i32 = arith.constant 0 : i32
    %c0_i32_0 = arith.constant 0 : i32
    %c0_i32_1 = arith.constant 0 : i32
    return %c0_i32, %c0_i32_0 : i32, i32
  }
  func.func @transform_3(%arg0: i32) -> (i32, i32) {
    %c0_i32 = arith.constant 0 : i32
    %c0_i32_0 = arith.constant 0 : i32
    %c0_i32_1 = arith.constant 0 : i32
    return %c0_i32, %c0_i32_0 : i32, i32
  }
  func.func @transform_4(%arg0: i32) -> (i32, i32) {
    %c0_i32 = arith.constant 0 : i32
    %c0_i32_0 = arith.constant 0 : i32
    %c0_i32_1 = arith.constant 0 : i32
    return %c0_i32, %c0_i32_0 : i32, i32
  }
  func.func @transform_5(%arg0: i32) -> (i32, i32) {
    %c0_i32 = arith.constant 0 : i32
    %c0_i32_0 = arith.constant 0 : i32
    return %arg0, %c0_i32 : i32, i32
  }
}

</mosaic_0001>

<bundles_post_ra>
// kernel: tpu_custom_call.1
= control target key start
LH: loop header
LB: loop body
LE: loop exit
PB: predicated region body
PF: predicated region fallthrough
CT: control target
= control target key end

     0   :  { %10 = vsyncpa [#allocation3], 0  ;;  %s419_s0 = inlined_call_operand.hbm [shape: f32[16,32], index: 0, kind: input, shape index: {}]   ;;  %s420_s1 = inlined_call_operand.hbm [shape: f32[32,128], index: 1, kind: input, shape index: {}]   ;;  %s421_s2 = inlined_call_operand.vmem [shape: f32[1,128], index: 2, kind: input, shape index: {}]   ;;  %s422_s3 = inlined_call_operand.hbm [shape: f32[128,128], index: 3, kind: input, shape index: {}]   ;;  %s423_s4 = inlined_call_operand.vmem [shape: f32[1,128], index: 4, kind: input, shape index: {}]   ;;  %s424_s5 = inlined_call_operand.hbm [shape: f32[16,128], index: 5, kind: output, shape index: {}]  }
   0x1   :  { %11 = vsyncpa [#allocation6], 0 }
   0x2   :  { %12 = vsyncpa [#allocation4], 0  ;;  %s30_s20 = sshll.u32 %s420_s1, 4  ;;  %s351_s21 = smov [#allocation5]   ;;  %s31_s20 = int_to_ptr.hbm [resolvable:$true] %s30_s20 }
   0x3   :  { %s32_s22 = sshll.u32 %s351_s21, 4  ;;  %s17_s25 = sshll.u32 %s419_s0, 4  ;;  %s33_s22 = int_to_ptr.vmem [resolvable:$true] %s32_s22  ;;  %s18_s25 = int_to_ptr.hbm [resolvable:$true] %s17_s25 }
   0x4   :  { %s352_s26 = smov 128   ;;  %s353_s27 = smov 8  }
   0x5   :  { %38 = dma.hbm_to_vmem [thread:$0]  %s31_s20, 512, %s33_s22, [#allocation6], %s352_s26, %s352_s26, %s353_s27  }
   0x6   :  { %s354_s28 = smov [#allocation2]   ;;  %s45_s1 = sshll.u32 %s422_s3, 4  ;;  %s46_s1 = int_to_ptr.hbm [resolvable:$true] %s45_s1 }
   0x7   :  { %s19_s29 = sshll.u32 %s354_s28, 4  ;;  %s355_s0 = smov [#allocation7]   ;;  %s20_s29 = int_to_ptr.vmem [resolvable:$true] %s19_s29 }
   0x8   :  { %25 = dma.hbm_to_vmem [thread:$0]  %s18_s25, 256, %s20_s29, [#allocation3], %s352_s26, %s352_s26, %s353_s27  }
   0x9   :  { %s47_s7 = sshll.u32 %s355_s0, 4  ;;  %s48_s7 = int_to_ptr.vmem [resolvable:$true] %s47_s7 }
   0xa   :  { %53 = dma.hbm_to_vmem [thread:$0]  %s46_s1, 2048, %s48_s7, [#allocation6], %s352_s26, %s352_s26, %s353_s27  }
   0xb   :  { %345 = dma.done.wait [#allocation3], 256  }
   0xc   :  { %346 = vsyncadd [#allocation3], 4294967040 }
   0xd   :  { %347 = dma.done.wait [#allocation6], 2560  }
   0xe   :  { %348 = vsyncadd [#allocation6], 4294964736  ;;  %v73_v0 = vld [vmem:[#allocation5 + $0x18] sm:$0xff]  ;;  %v72_v1 = vld [vmem:[#allocation5 + $0x10] sm:$0xff]  ;;  %vm78_vm0 = vcmask 261120   ;;  %s199_s13 = sshll.u32 %s424_s5, 4  ;;  %s200_s13 = int_to_ptr.hbm [resolvable:$true] %s199_s13 }
   0xf   :  { %97 = vmatpush.msra.mxu0 %v73_v0  ;;  %v71_v2 = vld [vmem:[#allocation5 + $0x8] sm:$0xff]  ;;  %v125_v3 = vld [vmem:[#allocation7 + $0x78] sm:$0xff]  ;;  %v124_v4 = vld [vmem:[#allocation7 + $0x70] sm:$0xff] }
  0x10   :  { %130 = vmatpush.msra.mxu1 %v125_v3  ;;  %v70_v5 = vld [vmem:[#allocation5] sm:$0xff]  ;;  %v123_v6 = vld [vmem:[#allocation7 + $0x68] sm:$0xff]  ;;  %217 = vmatpush.msra.mxu2 %v125_v3  ;;  %v68_v7 = vld [vmem:[#allocation2] sm:$0xff] }
  0x11   :  { %98 = vmatpush.msra.mxu0 %v72_v1  ;;  %v122_v8 = vld [vmem:[#allocation7 + $0x60] sm:$0xff]  ;;  %v121_v9 = vld [vmem:[#allocation7 + $0x58] sm:$0xff]  ;;  %v120_v10 = vld [vmem:[#allocation7 + $0x50] sm:$0xff] }
  0x12   :  { %131 = vmatpush.msra.mxu1 %v124_v4  ;;  %218 = vmatpush.msra.mxu2 %v124_v4  ;;  %v119_v11 = vld [vmem:[#allocation7 + $0x48] sm:$0xff]  ;;  %v69_v12 = vld [vmem:[#allocation2 + $0x8] sm:$0xff]  ;;  %v118_v13 = vld [vmem:[#allocation7 + $0x40] sm:$0xff] }
  0x13   :  { %99 = vmatpush.msra.mxu0 %v71_v2  ;;  %v117_v14 = vld [vmem:[#allocation7 + $0x38] sm:$0xff]  ;;  %v116_v15 = vld [vmem:[#allocation7 + $0x30] sm:$0xff]  ;;  %v115_v16 = vld [vmem:[#allocation7 + $0x28] sm:$0xff] }
  0x14   :  { %132 = vmatpush.msra.mxu1 %v123_v6  ;;  %219 = vmatpush.msra.mxu2 %v123_v6  ;;  %v114_v17 = vld [vmem:[#allocation7 + $0x20] sm:$0xff]  ;;  %v113_v18 = vld [vmem:[#allocation7 + $0x18] sm:$0xff]  ;;  %v112_v19 = vld [vmem:[#allocation7 + $0x10] sm:$0xff] }
  0x15   :  { %100 = vmatpush.msra.mxu0 %v70_v5  ;;  %v111_v20 = vld [vmem:[#allocation7 + $0x8] sm:$0xff]  ;;  %v110_v21 = vld [vmem:[#allocation7] sm:$0xff]  ;;  %v239_v22 = vld [vmem:[%s421_s2] ss:$0 sm:$0xff]  ;;  %s356_s2 = smov [#allocation8]  }
  0x16   :  { %213 = vmatmul.msk.f32.vlgmr.msra.gmra.mxu0 %vm78_vm0, %v68_v7  ;;  %133 = vmatpush.msra.mxu1 %v122_v8  ;;  %v240_v29 = vld [vmem:[%s423_s4] ss:$0 sm:$0xff]  ;;  %s197_s4 = sshll.u32 %s356_s2, 4  ;;  %s198_s4 = int_to_ptr.vmem [resolvable:$true] %s197_s4 }
  0x17   :  { %220 = vmatpush.msra.mxu2 %v122_v8 }
  0x18   :  { %134 = vmatpush.msra.mxu1 %v121_v9 }
  0x19   :  { %221 = vmatpush.msra.mxu2 %v121_v9 }
  0x1a   :  { %135 = vmatpush.msra.mxu1 %v120_v10 }
  0x1b   :  { %222 = vmatpush.msra.mxu2 %v120_v10 }
  0x1c   :  { %136 = vmatpush.msra.mxu1 %v119_v11 }
  0x1d   :  { %223 = vmatpush.msra.mxu2 %v119_v11 }
  0x1e   :  { %214 = vmatmul.msk.f32.gmra.mxu0 %vm78_vm0, %v69_v12  ;;  %137 = vmatpush.msra.mxu1 %v118_v13 }
  0x1f   :  { %224 = vmatpush.msra.mxu2 %v118_v13 }
  0x20   :  { %138 = vmatpush.msra.mxu1 %v117_v14 }
  0x21   :  { %225 = vmatpush.msra.mxu2 %v117_v14 }
  0x22   :  { %139 = vmatpush.msra.mxu1 %v116_v15 }
  0x23   :  { %226 = vmatpush.msra.mxu2 %v116_v15 }
  0x24   :  { %140 = vmatpush.msra.mxu1 %v115_v16 }
  0x25   :  { %227 = vmatpush.msra.mxu2 %v115_v16 }
  0x26   :  { %141 = vmatpush.msra.mxu1 %v114_v17 }
  0x27   :  { %228 = vmatpush.msra.mxu2 %v114_v17 }
  0x28   :  { %142 = vmatpush.msra.mxu1 %v113_v18 }
  0x29   :  { %229 = vmatpush.msra.mxu2 %v113_v18 }
  0x2a   :  { %143 = vmatpush.msra.mxu1 %v112_v19 }
  0x2b   :  { %230 = vmatpush.msra.mxu2 %v112_v19 }
  0x2c   :  { %144 = vmatpush.msra.mxu1 %v111_v20 }
  0x2d   :  { %231 = vmatpush.msra.mxu2 %v111_v20 }
  0x2e   :  { %145 = vmatpush.msra.mxu1 %v110_v21 }
  0x2f   :  { %232 = vmatpush.msra.mxu2 %v110_v21 }
  0x93   :  { %v102_v23 = vpop.f32.mrf.mxu0 }
  0x94   :  { %v103_v24 = vadd.f32 %v239_v22, %v102_v23 }
  0x96   :  { %v108_v25 = vmax.f32 %v103_v24, 0.0 }
  0x98   :  { %146 = vmatmul.f32.vlgmr.msra.gmra.mxu1 %v108_v25 }
  0x9b   :  { %v105_v26 = vpop.f32.mrf.mxu0 }
  0x9c   :  { %v106_v27 = vadd.f32 %v239_v22, %v105_v26 }
  0x9e   :  { %v109_v28 = vmax.f32 %v106_v27, 0.0 }
  0xa0   :  { %149 = vmatmul.f32.vlgmr.msra.gmra.mxu2 %v109_v28 }
 0x115   :  { %v147_v30 = vpop.f32.mrf.mxu1 }
 0x116   :  { %v148_v31 = vadd.f32 %v240_v29, %v147_v30 }
 0x118   :  { %v215_v32 = vmul.f32 -1.442695, %v148_v31 }
 0x11a   :  { %241 = vpow2.f32 %v215_v32 }
 0x120   :  { %v242_v33 = vpop.eup %241 }
 0x121   :  { %v159_v34 = vadd.f32 1.0, %v242_v33 }
 0x123   :  { %243 = vrcp.f32 %v159_v34  ;;  %v150_v35 = vpop.f32.mrf.mxu2  ;;  %v172_v41 = vand.u32 2147483648, %v159_v34  ;;  %v170_v44 = vand.u32 2147483647, %v159_v34  ;;  %vm166_vm2 = vweird.f32 %v159_v34 }
 0x124   :  { %v151_v36 = vadd.f32 %v240_v29, %v150_v35 }
 0x125   :  { %v173_v47 = vor.u32 1.1754944e-38, %v172_v41  ;;  %vm171_vm4 = vcmp.eq.f32.partialorder %v170_v44, 8.507059e+37 }
 0x126   :  { %v216_v37 = vmul.f32 -1.442695, %v151_v36 }
 0x128   :  { %245 = vpow2.f32 %v216_v37 }
 0x129   :  { %v244_v38 = vpop.eup %243 }
 0x12a   :  { %v162_v39 = vmul.f32 %v244_v38, %v159_v34  ;;  %vm167_vm1 = vweird.f32 %v244_v38 }
 0x12b   :  { %vm168_vm3 = vmor %vm166_vm2, %vm167_vm1 }
 0x12c   :  { %v163_v40 = vsub.f32 1.0, %v162_v39 }
 0x12e   :  { %v246_v42 = vpop.eup %245  ;;  %v164_v43 = vmul.f32 %v244_v38, %v163_v40 }
 0x12f   :  { %v160_v45 = vadd.f32 1.0, %v246_v42 }
 0x130   :  { %v165_v46 = vadd.f32 %v244_v38, %v164_v43 }
 0x131   :  { %247 = vrcp.f32 %v160_v45  ;;  %v187_v53 = vand.u32 2147483648, %v160_v45  ;;  %v185_v55 = vand.u32 2147483647, %v160_v45  ;;  %vm181_vm6 = vweird.f32 %v160_v45 }
 0x132   :  { %v169_v48 = vsel %vm168_vm3, %v244_v38, %v165_v46 }
 0x133   :  { %v174_v49 = vsel %vm171_vm4, %v173_v47, %v169_v48  ;;  %v188_v57 = vor.u32 1.1754944e-38, %v187_v53  ;;  %vm186_vm8 = vcmp.eq.f32.partialorder %v185_v55, 8.507059e+37 }
 0x134   :  { %191 = vst [vmem:[#allocation8] sm:$0xff] %v174_v49 }
 0x137   :  { %v248_v50 = vpop.eup %247 }
 0x138   :  { %v177_v51 = vmul.f32 %v248_v50, %v160_v45  ;;  %vm182_vm5 = vweird.f32 %v248_v50 }
 0x139   :  { %vm183_vm7 = vmor %vm181_vm6, %vm182_vm5 }
 0x13a   :  { %v178_v52 = vsub.f32 1.0, %v177_v51 }
 0x13c   :  { %v179_v54 = vmul.f32 %v248_v50, %v178_v52 }
 0x13e   :  { %v180_v56 = vadd.f32 %v248_v50, %v179_v54 }
 0x140   :  { %v184_v58 = vsel %vm183_vm7, %v248_v50, %v180_v56 }
 0x141   :  { %v189_v59 = vsel %vm186_vm8, %v188_v57, %v184_v58 }
 0x142   :  { %192 = vst [vmem:[#allocation8 + $0x8] sm:$0xff] %v189_v59 }
 0x143   :  { %205 = dma.vmem_to_hbm [thread:$0]  %s198_s4, 256, %s200_s13, [#allocation4], %s352_s26, %s352_s26, %s353_s27  }
 0x144   :  { %349 = dma.done.wait [#allocation4], 256  }
 0x145   :  { %350 = vsyncadd [#allocation4], 4294967040 }
 0x146   :  { %210 = vsyncpa [#allocation3], 1 }
 0x147   :  { %211 = vsyncpa [#allocation6], 1 }
 0x148   :  { %212 = vsyncpa [#allocation4], 1 }

// kernel: tpu_custom_call.1
= control target key start
LH: loop header
LB: loop body
LE: loop exit
PB: predicated region body
PF: predicated region fallthrough
CT: control target
= control target key end

     0   :  { %10 = vsyncpa [#allocation3], 0  ;;  %s419_s0 = inlined_call_operand.hbm [shape: f32[16,32], index: 0, kind: input, shape index: {}]   ;;  %s420_s1 = inlined_call_operand.hbm [shape: f32[32,128], index: 1, kind: input, shape index: {}]   ;;  %s421_s2 = inlined_call_operand.vmem [shape: f32[1,128], index: 2, kind: input, shape index: {}]   ;;  %s422_s3 = inlined_call_operand.hbm [shape: f32[128,128], index: 3, kind: input, shape index: {}]   ;;  %s423_s4 = inlined_call_operand.vmem [shape: f32[1,128], index: 4, kind: input, shape index: {}]   ;;  %s424_s5 = inlined_call_operand.hbm [shape: f32[16,128], index: 5, kind: output, shape index: {}]  }
   0x1   :  { %11 = vsyncpa [#allocation6], 0 }
   0x2   :  { %12 = vsyncpa [#allocation4], 0  ;;  %s30_s20 = sshll.u32 %s420_s1, 4  ;;  %s351_s21 = smov [#allocation5]   ;;  %s31_s20 = int_to_ptr.hbm [resolvable:$true] %s30_s20 }
   0x3   :  { %s32_s22 = sshll.u32 %s351_s21, 4  ;;  %s17_s25 = sshll.u32 %s419_s0, 4  ;;  %s33_s22 = int_to_ptr.vmem [resolvable:$true] %s32_s22  ;;  %s18_s25 = int_to_ptr.hbm [resolvable:$true] %s17_s25 }
   0x4   :  { %s352_s26 = smov 128   ;;  %s353_s27 = smov 8  }
   0x5   :  { %38 = dma.hbm_to_vmem [thread:$0]  %s31_s20, 512, %s33_s22, [#allocation6], %s352_s26, %s352_s26, %s353_s27  }
   0x6   :  { %s354_s28 = smov [#allocation2]   ;;  %s45_s1 = sshll.u32 %s422_s3, 4  ;;  %s46_s1 = int_to_ptr.hbm [resolvable:$true] %s45_s1 }
   0x7   :  { %s19_s29 = sshll.u32 %s354_s28, 4  ;;  %s355_s0 = smov [#allocation7]   ;;  %s20_s29 = int_to_ptr.vmem [resolvable:$true] %s19_s29 }
   0x8   :  { %25 = dma.hbm_to_vmem [thread:$0]  %s18_s25, 256, %s20_s29, [#allocation3], %s352_s26, %s352_s26, %s353_s27  }
   0x9   :  { %s47_s7 = sshll.u32 %s355_s0, 4  ;;  %s48_s7 = int_to_ptr.vmem [resolvable:$true] %s47_s7 }
   0xa   :  { %53 = dma.hbm_to_vmem [thread:$0]  %s46_s1, 2048, %s48_s7, [#allocation6], %s352_s26, %s352_s26, %s353_s27  }
   0xb   :  { %345 = dma.done.wait [#allocation3], 256  }
   0xc   :  { %346 = vsyncadd [#allocation3], 4294967040 }
   0xd   :  { %347 = dma.done.wait [#allocation6], 2560  }
   0xe   :  { %348 = vsyncadd [#allocation6], 4294964736  ;;  %v73_v0 = vld [vmem:[#allocation5 + $0x18] sm:$0xff]  ;;  %v72_v1 = vld [vmem:[#allocation5 + $0x10] sm:$0xff]  ;;  %vm78_vm0 = vcmask 261120   ;;  %s199_s13 = sshll.u32 %s424_s5, 4  ;;  %s200_s13 = int_to_ptr.hbm [resolvable:$true] %s199_s13 }
   0xf   :  { %97 = vmatpush.msra.mxu0 %v73_v0  ;;  %v71_v2 = vld [vmem:[#allocation5 + $0x8] sm:$0xff]  ;;  %v125_v3 = vld [vmem:[#allocation7 + $0x78] sm:$0xff]  ;;  %v124_v4 = vld [vmem:[#allocation7 + $0x70] sm:$0xff] }
  0x10   :  { %130 = vmatpush.msra.mxu1 %v125_v3  ;;  %v70_v5 = vld [vmem:[#allocation5] sm:$0xff]  ;;  %v123_v6 = vld [vmem:[#allocation7 + $0x68] sm:$0xff]  ;;  %217 = vmatpush.msra.mxu2 %v125_v3  ;;  %v68_v7 = vld [vmem:[#allocation2] sm:$0xff] }
  0x11   :  { %98 = vmatpush.msra.mxu0 %v72_v1  ;;  %v122_v8 = vld [vmem:[#allocation7 + $0x60] sm:$0xff]  ;;  %v121_v9 = vld [vmem:[#allocation7 + $0x58] sm:$0xff]  ;;  %v120_v10 = vld [vmem:[#allocation7 + $0x50] sm:$0xff] }
  0x12   :  { %131 = vmatpush.msra.mxu1 %v124_v4  ;;  %218 = vmatpush.msra.mxu2 %v124_v4  ;;  %v119_v11 = vld [vmem:[#allocation7 + $0x48] sm:$0xff]  ;;  %v69_v12 = vld [vmem:[#allocation2 + $0x8] sm:$0xff]  ;;  %v118_v13 = vld [vmem:[#allocation7 + $0x40] sm:$0xff] }
  0x13   :  { %99 = vmatpush.msra.mxu0 %v71_v2  ;;  %v117_v14 = vld [vmem:[#allocation7 + $0x38] sm:$0xff]  ;;  %v116_v15 = vld [vmem:[#allocation7 + $0x30] sm:$0xff]  ;;  %v115_v16 = vld [vmem:[#allocation7 + $0x28] sm:$0xff] }
  0x14   :  { %132 = vmatpush.msra.mxu1 %v123_v6  ;;  %219 = vmatpush.msra.mxu2 %v123_v6  ;;  %v114_v17 = vld [vmem:[#allocation7 + $0x20] sm:$0xff]  ;;  %v113_v18 = vld [vmem:[#allocation7 + $0x18] sm:$0xff]  ;;  %v112_v19 = vld [vmem:[#allocation7 + $0x10] sm:$0xff] }
  0x15   :  { %100 = vmatpush.msra.mxu0 %v70_v5  ;;  %v111_v20 = vld [vmem:[#allocation7 + $0x8] sm:$0xff]  ;;  %v110_v21 = vld [vmem:[#allocation7] sm:$0xff]  ;;  %v239_v22 = vld [vmem:[%s421_s2] ss:$0 sm:$0xff]  ;;  %s356_s2 = smov [#allocation8]  }
  0x16   :  { %213 = vmatmul.msk.f32.vlgmr.msra.gmra.mxu0 %vm78_vm0, %v68_v7  ;;  %133 = vmatpush.msra.mxu1 %v122_v8  ;;  %v240_v29 = vld [vmem:[%s423_s4] ss:$0 sm:$0xff]  ;;  %s197_s4 = sshll.u32 %s356_s2, 4  ;;  %s198_s4 = int_to_ptr.vmem [resolvable:$true] %s197_s4 }
  0x17   :  { %220 = vmatpush.msra.mxu2 %v122_v8 }
  0x18   :  { %134 = vmatpush.msra.mxu1 %v121_v9 }
  0x19   :  { %221 = vmatpush.msra.mxu2 %v121_v9 }
  0x1a   :  { %135 = vmatpush.msra.mxu1 %v120_v10 }
  0x1b   :  { %222 = vmatpush.msra.mxu2 %v120_v10 }
  0x1c   :  { %136 = vmatpush.msra.mxu1 %v119_v11 }
  0x1d   :  { %223 = vmatpush.msra.mxu2 %v119_v11 }
  0x1e   :  { %214 = vmatmul.msk.f32.gmra.mxu0 %vm78_vm0, %v69_v12  ;;  %137 = vmatpush.msra.mxu1 %v118_v13 }
  0x1f   :  { %224 = vmatpush.msra.mxu2 %v118_v13 }
  0x20   :  { %138 = vmatpush.msra.mxu1 %v117_v14 }
  0x21   :  { %225 = vmatpush.msra.mxu2 %v117_v14 }
  0x22   :  { %139 = vmatpush.msra.mxu1 %v116_v15 }
  0x23   :  { %226 = vmatpush.msra.mxu2 %v116_v15 }
  0x24   :  { %140 = vmatpush.msra.mxu1 %v115_v16 }
  0x25   :  { %227 = vmatpush.msra.mxu2 %v115_v16 }
  0x26   :  { %141 = vmatpush.msra.mxu1 %v114_v17 }
  0x27   :  { %228 = vmatpush.msra.mxu2 %v114_v17 }
  0x28   :  { %142 = vmatpush.msra.mxu1 %v113_v18 }
  0x29   :  { %229 = vmatpush.msra.mxu2 %v113_v18 }
  0x2a   :  { %143 = vmatpush.msra.mxu1 %v112_v19 }
  0x2b   :  { %230 = vmatpush.msra.mxu2 %v112_v19 }
  0x2c   :  { %144 = vmatpush.msra.mxu1 %v111_v20 }
  0x2d   :  { %231 = vmatpush.msra.mxu2 %v111_v20 }
  0x2e   :  { %145 = vmatpush.msra.mxu1 %v110_v21 }
  0x2f   :  { %232 = vmatpush.msra.mxu2 %v110_v21 }
  0x93   :  { %v102_v23 = vpop.f32.mrf.mxu0 }
  0x94   :  { %v103_v24 = vadd.f32 %v239_v22, %v102_v23 }
  0x96   :  { %v108_v25 = vmax.f32 %v103_v24, 0.0 }
  0x98   :  { %146 = vmatmul.f32.vlgmr.msra.gmra.mxu1 %v108_v25 }
  0x9b   :  { %v105_v26 = vpop.f32.mrf.mxu0 }
  0x9c   :  { %v106_v27 = vadd.f32 %v239_v22, %v105_v26 }
  0x9e   :  { %v109_v28 = vmax.f32 %v106_v27, 0.0 }
  0xa0   :  { %149 = vmatmul.f32.vlgmr.msra.gmra.mxu2 %v109_v28 }
 0x115   :  { %v147_v30 = vpop.f32.mrf.mxu1 }
 0x116   :  { %v148_v31 = vadd.f32 %v240_v29, %v147_v30 }
 0x118   :  { %v215_v32 = vmul.f32 -1.442695, %v148_v31 }
 0x11a   :  { %241 = vpow2.f32 %v215_v32 }
 0x120   :  { %v242_v33 = vpop.eup %241 }
 0x121   :  { %v159_v34 = vadd.f32 1.0, %v242_v33 }
 0x123   :  { %243 = vrcp.f32 %v159_v34  ;;  %v150_v35 = vpop.f32.mrf.mxu2  ;;  %v172_v41 = vand.u32 2147483648, %v159_v34  ;;  %v170_v44 = vand.u32 2147483647, %v159_v34  ;;  %vm166_vm2 = vweird.f32 %v159_v34 }
 0x124   :  { %v151_v36 = vadd.f32 %v240_v29, %v150_v35 }
 0x125   :  { %v173_v47 = vor.u32 1.1754944e-38, %v172_v41  ;;  %vm171_vm4 = vcmp.eq.f32.partialorder %v170_v44, 8.507059e+37 }
 0x126   :  { %v216_v37 = vmul.f32 -1.442695, %v151_v36 }
 0x128   :  { %245 = vpow2.f32 %v216_v37 }
 0x129   :  { %v244_v38 = vpop.eup %243 }
 0x12a   :  { %v162_v39 = vmul.f32 %v244_v38, %v159_v34  ;;  %vm167_vm1 = vweird.f32 %v244_v38 }
 0x12b   :  { %vm168_vm3 = vmor %vm166_vm2, %vm167_vm1 }
 0x12c   :  { %v163_v40 = vsub.f32 1.0, %v162_v39 }
 0x12e   :  { %v246_v42 = vpop.eup %245  ;;  %v164_v43 = vmul.f32 %v244_v38, %v163_v40 }
 0x12f   :  { %v160_v45 = vadd.f32 1.0, %v246_v42 }
 0x130   :  { %v165_v46 = vadd.f32 %v244_v38, %v164_v43 }
 0x131   :  { %247 = vrcp.f32 %v160_v45  ;;  %v187_v53 = vand.u32 2147483648, %v160_v45  ;;  %v185_v55 = vand.u32 2147483647, %v160_v45  ;;  %vm181_vm6 = vweird.f32 %v160_v45 }
 0x132   :  { %v169_v48 = vsel %vm168_vm3, %v244_v38, %v165_v46 }
 0x133   :  { %v174_v49 = vsel %vm171_vm4, %v173_v47, %v169_v48  ;;  %v188_v57 = vor.u32 1.1754944e-38, %v187_v53  ;;  %vm186_vm8 = vcmp.eq.f32.partialorder %v185_v55, 8.507059e+37 }
 0x134   :  { %191 = vst [vmem:[#allocation8] sm:$0xff] %v174_v49 }
 0x137   :  { %v248_v50 = vpop.eup %247 }
 0x138   :  { %v177_v51 = vmul.f32 %v248_v50, %v160_v45  ;;  %vm182_vm5 = vweird.f32 %v248_v50 }
 0x139   :  { %vm183_vm7 = vmor %vm181_vm6, %vm182_vm5 }
 0x13a   :  { %v178_v52 = vsub.f32 1.0, %v177_v51 }
 0x13c   :  { %v179_v54 = vmul.f32 %v248_v50, %v178_v52 }
 0x13e   :  { %v180_v56 = vadd.f32 %v248_v50, %v179_v54 }
 0x140   :  { %v184_v58 = vsel %vm183_vm7, %v248_v50, %v180_v56 }
 0x141   :  { %v189_v59 = vsel %vm186_vm8, %v188_v57, %v184_v58 }
 0x142   :  { %192 = vst [vmem:[#allocation8 + $0x8] sm:$0xff] %v189_v59 }
 0x143   :  { %205 = dma.vmem_to_hbm [thread:$0]  %s198_s4, 256, %s200_s13, [#allocation4], %s352_s26, %s352_s26, %s353_s27  }
 0x144   :  { %349 = dma.done.wait [#allocation4], 256  }
 0x145   :  { %350 = vsyncadd [#allocation4], 4294967040 }
 0x146   :  { %210 = vsyncpa [#allocation3], 1 }
 0x147   :  { %211 = vsyncpa [#allocation6], 1 }
 0x148   :  { %212 = vsyncpa [#allocation4], 1 }

</bundles_post_ra>
